<compile_context>
chip_gen: v7x
topology: tpu7x:2x2x1
jax: 0.10.0
libtpu: 0.0.40
codegen_flags: <defaults>
</compile_context>

<pallas_src>
import functools

import jax
import jax.numpy as jnp
from jax import lax
from jax.experimental import pallas as pl
from jax.experimental.pallas import tpu as pltpu

LANES = 128
MAX_BLOCK_ROWS = 8192        # 8192 x 128 x 4B = 4 MiB per f32 input block
CHUNK_ROWS = 512             # inner elementwise sub-chunk (bounds live ranges)
_VMEM_LIMIT_BYTES = 32 * 1024 * 1024


def _round_up(x, m):
    return -(-x // m) * m


def _tensorcores_per_device():
    """2 on v7x (two TensorCores per device); 1 on v5e/v6e. Defensive parse."""
    try:
        kind = jax.devices()[0].device_kind.lower()
    except Exception:
        return 1
    return 2 if ("v7" in kind or "tpu7" in kind or "7x" in kind) else 1


def _focal_loss_kernel(
    x_ref, t_ref, out_ref, acc_ref, *,
    alpha, gamma, n_valid, block_rows, blocks_per_split, chunk_rows,
    needs_mask, binary_targets,
):
    c = pl.program_id(0)   # TensorCore split ("parallel")
    j = pl.program_id(1)   # reduction axis ("arbitrary")

    @pl.when(j == 0)
    def _init():
        acc_ref[...] = jnp.zeros_like(acc_ref)

    # Logical (unclamped) row offset of this block in the flattened (rows, 128)
    # view.  Phantom / overhang / lane-pad elements are zeroed by the mask.
    block_row0 = (c * blocks_per_split + j) * block_rows

    full_rows = n_valid // LANES          # static Python ints
    rem_lanes = n_valid % LANES
    num_chunks = block_rows // chunk_rows
    g = float(gamma)
    a = float(alpha)

    def chunk_body(i, carry):
        r0 = pl.multiple_of(i * chunk_rows, chunk_rows)
        x = x_ref[pl.ds(r0, chunk_rows), :].astype(jnp.float32)
        t = t_ref[pl.ds(r0, chunk_rows), :].astype(jnp.float32)

        # Numerically-stable BCE-with-logits (matches torch):
        #   bce = relu(x) - x*t + log1p(exp(-|x|))
        e = jnp.exp(-jnp.abs(x))                              # EUP #1
        bce = jnp.maximum(x, 0.0) - x * t + jnp.log1p(e)      # EUP #2

        if binary_targets:
            # pt = exp(-bce) without a 3rd transcendental.  For t in {0, 1}:
            #   exp(x*t - relu(x)) = 1 if t matches sign(x) else exp(-|x|)
            # so pt = sel / (1 + e).  Approx reciprocal (EUP, cheap) + two
            # Newton steps (VPU) restores full f32 accuracy.
            match = (x >= 0.0) == (t >= 0.5)
            sel = jnp.where(match, 1.0, e)
            d = 1.0 + e
            r = pl.reciprocal(d, approx=True)
            r = r * (2.0 - d * r)
            r = r * (2.0 - d * r)
            pt = sel * r
        else:
            pt = jnp.exp(-bce)                                # general targets

        one_m_pt = 1.0 - pt
        if g == 2.0:
            mod = one_m_pt * one_m_pt          # module default: avoid float pow
        elif g == 1.0:
            mod = one_m_pt
        elif g == 0.0:
            mod = None
        else:
            mod = one_m_pt ** g

        focal = bce if mod is None else mod * bce
        if a != 1.0:
            focal = a * focal

        if needs_mask:
            row_ids = (block_row0 + r0) + lax.broadcasted_iota(
                jnp.int32, (chunk_rows, LANES), 0)
            valid = row_ids < full_rows
            if rem_lanes:
                lane_ids = lax.broadcasted_iota(
                    jnp.int32, (chunk_rows, LANES), 1)
                valid = valid | ((row_ids == full_rows) & (lane_ids < rem_lanes))
            focal = jnp.where(valid, focal, 0.0)

        # Pure-VPU sublane partial sum into the (8, 128) vector accumulator;
        # the single cross-lane reduce happens only in the finalize step.
        acc_ref[...] += focal.reshape(chunk_rows // 8, 8, LANES).sum(axis=0)
        return carry

    lax.fori_loop(0, num_chunks, chunk_body, 0)

    @pl.when(j == pl.num_programs(1) - 1)
    def _finalize():
        out_ref[0, 0] = jnp.sum(acc_ref[...])


def focal_loss(inputs, targets, alpha=1.0, gamma=2.0, binary_targets=True):
    """Mean focal loss over all elements of `inputs` (logits) vs `targets`.

    `binary_targets=True` assumes targets are {0, 1} (the module's use case)
    and saves one transcendental per element; set False for soft targets.
    """
    assert inputs.shape == targets.shape
    n_valid = int(inputs.size)
    assert n_valid > 0

    x_flat = inputs.reshape(-1)
    t_flat = targets.reshape(-1)

    # Only pad up to the next lane multiple (needed to view the flat array as
    # (rows, 128) at all); skipped entirely when numel % 128 == 0.  Everything
    # else (block / split rounding, tail rows) is an in-kernel mask, so no
    # full-array pad copies for tiling.
    lane_pad = (-n_valid) % LANES
    if lane_pad:
        x_flat = jnp.pad(x_flat, (0, lane_pad))
        t_flat = jnp.pad(t_flat, (0, lane_pad))
    rows = (n_valid + lane_pad) // LANES
    x2 = x_flat.reshape(rows, LANES)
    t2 = t_flat.reshape(rows, LANES)

    # --- block / grid sizing (all static Python ints) -----------------------
    if rows >= MAX_BLOCK_ROWS:
        block_rows = MAX_BLOCK_ROWS
    elif rows > CHUNK_ROWS:
        block_rows = _round_up(rows, CHUNK_ROWS)
    else:
        block_rows = _round_up(rows, 8)
    chunk_rows = min(block_rows, CHUNK_ROWS)
    total_blocks = -(-rows // block_rows)

    # 2-way split only where there really are 2 TensorCores (v7x); on 1-TC
    # chips it would just be a serial loop plus dead DMA.
    num_splits = 2 if (_tensorcores_per_device() >= 2 and total_blocks >= 2) else 1
    blocks_per_split = -(-total_blocks // num_splits)

    # Mask only when the grid's logical coverage differs from the valid count
    # (tail rows / lane padding / phantom blocks); fully-tiling sizes skip it.
    covered = num_splits * blocks_per_split * block_rows * LANES
    needs_mask = covered != n_valid

    kernel = functools.partial(
        _focal_loss_kernel,
        alpha=float(alpha), gamma=float(gamma), n_valid=n_valid,
        block_rows=block_rows, blocks_per_split=blocks_per_split,
        chunk_rows=chunk_rows, needs_mask=needs_mask,
        binary_targets=bool(binary_targets),
    )

    last_block = total_blocks - 1

    def in_index_map(c, j):
        # Clamp phantom blocks (uneven split) onto the last real block: the
        # previous grid step already holds that block so Pallas skips the DMA,
        # and the in-kernel mask zeroes its (already counted) contribution.
        return (jnp.minimum(c * blocks_per_split + j, last_block), 0)

    partials = pl.pallas_call(
        kernel,
        out_shape=jax.ShapeDtypeStruct((num_splits, 1), jnp.float32),
        grid_spec=pltpu.PrefetchScalarGridSpec(
            num_scalar_prefetch=0,
            grid=(num_splits, blocks_per_split),
            in_specs=[
                pl.BlockSpec((block_rows, LANES), in_index_map),
                pl.BlockSpec((block_rows, LANES), in_index_map),
            ],
            out_specs=pl.BlockSpec(
                (1, 1), lambda c, j: (c, 0), memory_space=pltpu.SMEM
            ),
            scratch_shapes=[pltpu.VMEM((8, LANES), jnp.float32)],
        ),
        compiler_params=pltpu.CompilerParams(
            dimension_semantics=("parallel", "arbitrary"),
            vmem_limit_bytes=_VMEM_LIMIT_BYTES,
        ),
    )(x2, t2)

    return jnp.sum(partials) / jnp.float32(n_valid)


def _focal_loss_ref(inputs, targets, alpha=1.0, gamma=2.0):
    x = inputs.astype(jnp.float32)
    t = targets.astype(jnp.float32)
    bce = jnp.maximum(x, 0.0) - x * t + jnp.log1p(jnp.exp(-jnp.abs(x)))
    pt = jnp.exp(-bce)
    return jnp.mean(alpha * (1.0 - pt) ** gamma * bce)


if __name__ == "__main__":
    key = jax.random.PRNGKey(0)
    k1, k2, k3, k4 = jax.random.split(key, 4)

    # NCHW logits + binary targets, matching the PyTorch module's usage.
    inputs = jax.random.normal(k1, (2, 4, 16, 16), dtype=jnp.float32)
    targets = (jax.random.uniform(k2, (2, 4, 16, 16)) > 0.5).astype(jnp.float32)

    loss = jax.block_until_ready(focal_loss(inputs, targets, alpha=1.0, gamma=2.0))
    ref = _focal_loss_ref(inputs, targets, alpha=1.0, gamma=2.0)
    assert jnp.allclose(loss, ref, rtol=1e-5, atol=1e-6), (loss, ref)

    # Size not a multiple of 128: exercises the in-kernel tail mask path.
    inputs2 = jax.random.normal(k3, (2, 4, 10, 12), dtype=jnp.float32)
    targets2 = (jax.random.uniform(k4, (2, 4, 10, 12)) > 0.5).astype(jnp.float32)
    loss2 = jax.block_until_ready(focal_loss(inputs2, targets2))
    ref2 = _focal_loss_ref(inputs2, targets2)
    assert jnp.allclose(loss2, ref2, rtol=1e-5, atol=1e-6), (loss2, ref2)

    print("KERNEL_OK")
</pallas_src>

<mosaic_0001>
module attributes {stable_mosaic.version = 11 : i64} {
  func.func @_focal_loss_kernel(%arg0: i32, %arg1: i32, %arg2: memref<16x128xf32, #tpu.memory_space<vmem>>, %arg3: memref<16x128xf32, #tpu.memory_space<vmem>>, %arg4: memref<1x1xf32, #tpu.memory_space<smem>>, %arg5: memref<8x128xf32, #tpu.memory_space<vmem>>) attributes {dimension_semantics = [#tpu.dimension_semantics<parallel>, #tpu.dimension_semantics<arbitrary>], iteration_bounds = array<i64: 1, 1>, scalar_prefetch = 0 : i64, scratch_operands = 1 : i64, tpu.core_type = #tpu.core_type<tc>, window_params = [{transform_indices = @transform_0, window_bounds = array<i64: 16, 128>}, {transform_indices = @transform_1, window_bounds = array<i64: 16, 128>}, {transform_indices = @transform_2, window_bounds = array<i64: 1, 1>}]} {
    %c0_i32 = arith.constant 0 : i32
    %0 = arith.cmpi eq, %arg1, %c0_i32 : i32
    %1 = arith.extui %0 : i1 to i32
    %c0_i32_0 = arith.constant 0 : i32
    %2 = arith.cmpi ne, %1, %c0_i32_0 : i32
    scf.if %2 {
      %cst_19 = arith.constant 0.000000e+00 : f32
      %51 = vector.broadcast %cst_19 : f32 to vector<8x128xf32>
      %c0_20 = arith.constant 0 : index
      %c0_21 = arith.constant 0 : index
      %52 = vector.load %arg5[%c0_20, %c0_21] : memref<8x128xf32, #tpu.memory_space<vmem>>, vector<8x128xf32>
      tpu.vector_store %arg5[%c0_20, %c0_21], %51 {strides = array<i32>} : memref<8x128xf32, #tpu.memory_space<vmem>>, vector<8x128xf32>,
    } else {
    }
    %c0_i32_1 = arith.constant 0 : i32
    %c16_i32 = arith.constant 16 : i32
    %3 = arith.muli %c0_i32_1, %c16_i32 : i32
    %4 = tpu.assume_multiple %3, 16 : i32
    %5 = arith.index_cast %4 : i32 to index
    %c0 = arith.constant 0 : index
    %6 = vector.load %arg2[%5, %c0] : memref<16x128xf32, #tpu.memory_space<vmem>>, vector<16x128xf32>
    %7 = arith.index_cast %4 : i32 to index
    %c0_2 = arith.constant 0 : index
    %8 = vector.load %arg3[%7, %c0_2] : memref<16x128xf32, #tpu.memory_space<vmem>>, vector<16x128xf32>
    %9 = math.absf %6 : vector<16x128xf32>
    %cst = arith.constant 0.000000e+00 : f32
    %10 = vector.broadcast %cst : f32 to vector<16x128xf32>
    %11 = arith.subf %10, %9 : vector<16x128xf32>
    %12 = math.exp %11 : vector<16x128xf32>
    %cst_3 = arith.constant 0.000000e+00 : f32
    %13 = vector.broadcast %cst_3 : f32 to vector<16x128xf32>
    %14 = arith.maximumf %6, %13 : vector<16x128xf32>
    %15 = arith.mulf %6, %8 : vector<16x128xf32>
    %16 = arith.subf %14, %15 : vector<16x128xf32>
    %17 = math.log1p %12 : vector<16x128xf32>
    %18 = arith.addf %16, %17 : vector<16x128xf32>
    %cst_4 = arith.constant 0.000000e+00 : f32
    %19 = vector.broadcast %cst_4 : f32 to vector<16x128xf32>
    %20 = arith.cmpf oge, %6, %19 : vector<16x128xf32>
    %cst_5 = arith.constant 5.000000e-01 : f32
    %21 = vector.broadcast %cst_5 : f32 to vector<16x128xf32>
    %22 = arith.cmpf oge, %8, %21 : vector<16x128xf32>
    %23 = arith.xori %20, %22 : vector<16x128xi1>
    %cst_6 = arith.constant dense<true> : vector<16x128xi1>
    %24 = arith.xori %23, %cst_6 : vector<16x128xi1>
    %cst_7 = arith.constant 1.000000e+00 : f32
    %25 = vector.broadcast %cst_7 : f32 to vector<16x128xf32>
    %26 = arith.select %24, %25, %12 : vector<16x128xi1>, vector<16x128xf32>
    %cst_8 = arith.constant 1.000000e+00 : f32
    %27 = vector.broadcast %cst_8 : f32 to vector<16x128xf32>
    %28 = arith.addf %27, %12 : vector<16x128xf32>
    %29 = tpu.reciprocal %28 {approx = true} : vector<16x128xf32> -> vector<16x128xf32>
    %30 = arith.mulf %28, %29 : vector<16x128xf32>
    %cst_9 = arith.constant 2.000000e+00 : f32
    %31 = vector.broadcast %cst_9 : f32 to vector<16x128xf32>
    %32 = arith.subf %31, %30 : vector<16x128xf32>
    %33 = arith.mulf %29, %32 : vector<16x128xf32>
    %34 = arith.mulf %28, %33 : vector<16x128xf32>
    %cst_10 = arith.constant 2.000000e+00 : f32
    %35 = vector.broadcast %cst_10 : f32 to vector<16x128xf32>
    %36 = arith.subf %35, %34 : vector<16x128xf32>
    %37 = arith.mulf %33, %36 : vector<16x128xf32>
    %38 = arith.mulf %26, %37 : vector<16x128xf32>
    %cst_11 = arith.constant 1.000000e+00 : f32
    %39 = vector.broadcast %cst_11 : f32 to vector<16x128xf32>
    %40 = arith.subf %39, %38 : vector<16x128xf32>
    %41 = arith.mulf %40, %40 : vector<16x128xf32>
    %42 = arith.mulf %41, %18 : vector<16x128xf32>
    %c0_12 = arith.constant 0 : index
    %c0_13 = arith.constant 0 : index
    %43 = vector.load %arg5[%c0_12, %c0_13] : memref<8x128xf32, #tpu.memory_space<vmem>>, vector<8x128xf32>
    %44 = vector.shape_cast %42 : vector<16x128xf32> to vector<2x8x128xf32>
    %cst_14 = arith.constant dense<0.000000e+00> : vector<8x128xf32>
    %45 = vector.multi_reduction <add>, %44, %cst_14 [0] : vector<2x8x128xf32> to vector<8x128xf32>
    %46 = arith.addf %43, %45 : vector<8x128xf32>
    %c0_15 = arith.constant 0 : index
    %c0_16 = arith.constant 0 : index
    %47 = vector.load %arg5[%c0_15, %c0_16] : memref<8x128xf32, #tpu.memory_space<vmem>>, vector<8x128xf32>
    tpu.vector_store %arg5[%c0_15, %c0_16], %46 {strides = array<i32>} : memref<8x128xf32, #tpu.memory_space<vmem>>, vector<8x128xf32>,
    %c1_i32 = arith.constant 1 : i32
    %c0_i32_17 = arith.constant 0 : i32
    %48 = arith.cmpi eq, %arg1, %c0_i32_17 : i32
    %49 = arith.extui %48 : i1 to i32
    %c0_i32_18 = arith.constant 0 : i32
    %50 = arith.cmpi ne, %49, %c0_i32_18 : i32
    scf.if %50 {
      %c0_19 = arith.constant 0 : index
      %c0_20 = arith.constant 0 : index
      %51 = vector.load %arg5[%c0_19, %c0_20] : memref<8x128xf32, #tpu.memory_space<vmem>>, vector<8x128xf32>
      %52 = vector.shape_cast %51 : vector<8x128xf32> to vector<1x8x128xf32>
      %cst_21 = arith.constant dense<0.000000e+00> : vector<1xf32>
      %53 = vector.multi_reduction <add>, %52, %cst_21 [1, 2] : vector<1x8x128xf32> to vector<1xf32>
      %54 = vector.shape_cast %53 : vector<1xf32> to vector<1x1x1xf32>
      %55 = vector.extract %54[0, 0, 0] : f32 from vector<1x1x1xf32>
      %c0_22 = arith.constant 0 : index
      %c0_23 = arith.constant 0 : index
      %56 = memref.load %arg4[%c0_22, %c0_23] : memref<1x1xf32, #tpu.memory_space<smem>>
      memref.store %55, %arg4[%c0_22, %c0_23] : memref<1x1xf32, #tpu.memory_space<smem>>
    } else {
    }
    return
  }
  func.func @transform_0(%arg0: i32, %arg1: i32) -> (i32, i32) {
    %c1_i32 = arith.constant 1 : i32
    %0 = arith.muli %arg0, %c1_i32 : i32
    %1 = arith.addi %0, %arg1 : i32
    %c0_i32 = arith.constant 0 : i32
    %2 = arith.minsi %1, %c0_i32 : i32
    %c0_i32_0 = arith.constant 0 : i32
    %c0_i32_1 = arith.constant 0 : i32
    return %2, %c0_i32_0 : i32, i32
  }
  func.func @transform_1(%arg0: i32, %arg1: i32) -> (i32, i32) {
    %c1_i32 = arith.constant 1 : i32
    %0 = arith.muli %arg0, %c1_i32 : i32
    %1 = arith.addi %0, %arg1 : i32
    %c0_i32 = arith.constant 0 : i32
    %2 = arith.minsi %1, %c0_i32 : i32
    %c0_i32_0 = arith.constant 0 : i32
    %c0_i32_1 = arith.constant 0 : i32
    return %2, %c0_i32_0 : i32, i32
  }
  func.func @transform_2(%arg0: i32, %arg1: i32) -> (i32, i32) {
    %c0_i32 = arith.constant 0 : i32
    %c0_i32_0 = arith.constant 0 : i32
    return %arg0, %c0_i32 : i32, i32
  }
}

</mosaic_0001>

<bundles_post_ra>
// kernel: tpu_custom_call.1
= control target key start
LH: loop header
LB: loop body
LE: loop exit
PB: predicated region body
PF: predicated region fallthrough
CT: control target
= control target key end

     0   :  { %7 = vsyncpa [#allocation4], 0  ;;  %s336_s0 = inlined_call_operand.hbm [shape: f32[16,128], index: 0, kind: input, shape index: {}]   ;;  %s337_s1 = inlined_call_operand.hbm [shape: f32[16,128], index: 1, kind: input, shape index: {}]   ;;  %s338_s2 = inlined_call_operand.hbm [shape: f32[1,1], index: 2, kind: output, shape index: {}]  }
   0x1   :  { %8 = vsyncpa [#allocation7], 0 }
   0x2   :  { %9 = vsyncpa [#allocation5], 0  ;;  %s255_s9 = smov [#allocation3]   ;;  %s195_s13 = scalar_lea.hbm %s336_s0, 256 }
   0x3   :  { %s21_s10 = sshll.u32 %s255_s9, 4  ;;  %p196_p0 = scmp.ne.s32.totalorder %s336_s0, %s195_s13  ;;  %s22_s10 = int_to_ptr.vmem [resolvable:$true] %s21_s10 }
   0x4   :  { %p199_p1 = scmp.lt.u32.totalorder %s195_s13, %s336_s0 }
   0x6   :  { %p201_p2 = pnand %p199_p1, %p196_p0 }
   0x8   :  { %204 = shalt.err (!%p201_p2)
}
   0x9   :  { %s205_s18 = scalar_lea.vmem %s22_s10, 256  ;;  %p210_p4 = scmp.lt.s32.totalorder %s22_s10, %s22_s10 }
   0xa   :  { %p206_p3 = scmp.ne.s32.totalorder %s22_s10, %s205_s18  ;;  %p211_p5 = scmp.lt.s32.totalorder %s205_s18, %s205_s18 }
   0xc   :  { %p212_p6 = por %p211_p5, %p210_p4 }
   0xe   :  { %p213_p7 = pnand %p212_p6, %p206_p3 }
  0x10   :  { %216 = shalt.err (!%p213_p7)
}
  0x11   :  { %s256_s19 = smov 128   ;;  %s257_s20 = smov 8  }
  0x12   :  { %27 = dma.hbm_to_vmem [thread:$0]  %s336_s0, 256, %s22_s10, [#allocation4], %s256_s19, %s256_s19, %s257_s20  }
  0x13   :  { %s258_s23 = smov [#allocation6]   ;;  %s217_s27 = scalar_lea.hbm %s337_s1, 256 }
  0x14   :  { %s39_s24 = sshll.u32 %s258_s23, 4  ;;  %p218_p8 = scmp.ne.s32.totalorder %s337_s1, %s217_s27  ;;  %s40_s24 = int_to_ptr.vmem [resolvable:$true] %s39_s24 }
  0x15   :  { %p221_p9 = scmp.lt.u32.totalorder %s217_s27, %s337_s1 }
  0x17   :  { %p223_p10 = pnand %p221_p9, %p218_p8 }
  0x19   :  { %226 = shalt.err (!%p223_p10)
}
  0x1a   :  { %s227_s4 = scalar_lea.vmem %s40_s24, 256  ;;  %p232_p12 = scmp.lt.s32.totalorder %s40_s24, %s40_s24 }
  0x1b   :  { %p228_p11 = scmp.ne.s32.totalorder %s40_s24, %s227_s4  ;;  %p233_p13 = scmp.lt.s32.totalorder %s227_s4, %s227_s4 }
  0x1d   :  { %p234_p0 = por %p233_p13, %p232_p12 }
  0x1f   :  { %p235_p1 = pnand %p234_p0, %p228_p11 }
  0x21   :  { %238 = shalt.err (!%p235_p1)
}
  0x22   :  { %45 = dma.hbm_to_vmem [thread:$0]  %s337_s1, 256, %s40_s24, [#allocation7], %s256_s19, %s256_s19, %s257_s20  }
  0x23   :  { %249 = dma.done.wait [#allocation4], 256  }
  0x24   :  { %250 = vsyncadd [#allocation4], 4294967040 }
  0x25   :  { %251 = dma.done.wait [#allocation7], 256  }
  0x26   :  { %252 = vsyncadd [#allocation7], 4294967040  ;;  %v65_v0 = vld [vmem:[#allocation3] sm:$0xff]  ;;  %v300_v1 = vld [vmem:[#allocation3 + $0x8] sm:$0xff]  ;;  %vm259_vm6 = vmmov 1   ;;  %s239_s8 = scalar_lea.hbm %s338_s2, 16 }
  0x27   :  { %v69_v2 = vand.u32 2147483647, %v65_v0  ;;  %v70_v3 = vand.u32 2147483647, %v300_v1  ;;  %v67_v12 = vld [vmem:[#allocation6] sm:$0xff]  ;;  %v68_v13 = vld [vmem:[#allocation6 + $0x8] sm:$0xff]  ;;  %p240_p2 = scmp.ne.s32.totalorder %s338_s2, %s239_s8  ;;  %p243_p3 = scmp.lt.u32.totalorder %s239_s8, %s338_s2 }
  0x28   :  { %vm103_vm0 = vcmp.ge.f32.partialorder %v65_v0, 0.0  ;;  %vm105_vm1 = vcmp.ge.f32.partialorder %v67_v12, 0.5  ;;  %vm104_vm2 = vcmp.ge.f32.partialorder %v300_v1, 0.0  ;;  %vm106_vm3 = vcmp.ge.f32.partialorder %v68_v13, 0.5 }
  0x29   :  { %v71_v4 = vsub.f32 0.0, %v69_v2  ;;  %v72_v5 = vsub.f32 0.0, %v70_v3  ;;  %vm107_vm4 = vmxor %vm103_vm0, %vm105_vm1  ;;  %v77_v30 = vmax.f32 %v65_v0, 0.0  ;;  %v78_v31 = vmax.f32 %v300_v1, 0.0  ;;  %p245_p4 = pnand %p243_p3, %p240_p2 }
  0x2a   :  { %vm108_vm5 = vmxor %vm104_vm2, %vm106_vm3  ;;  %v79_v32 = vmul.f32 %v67_v12, %v65_v0  ;;  %v80_v35 = vmul.f32 %v68_v13, %v300_v1 }
  0x2b   :  { %v73_v6 = vmul.f32 1.442695, %v71_v4  ;;  %v75_v7 = vmul.f32 1.442695, %v72_v5  ;;  %vm305_vm7 = vmxor %vm107_vm4, %vm259_vm6 }
  0x2c   :  { %vm310_vm8 = vmxor %vm108_vm5, %vm259_vm6  ;;  %v81_v46 = vsub.f32 %v77_v30, %v79_v32  ;;  %v82_v49 = vsub.f32 %v78_v31, %v80_v35 }
  0x2d   :  { %183 = vpow2.f32 %v73_v6 }
  0x2e   :  { %185 = vpow2.f32 %v75_v7 }
  0x37   :  { %v184_v8 = vpop.eup %183 }
  0x38   :  { %v186_v9 = vpop.eup %185  ;;  %v83_v10 = vadd.f32 1.0, %v184_v8  ;;  %v86_v15 = vmul.f32 -0.5, %v184_v8  ;;  %v89_v24 = vand.u32 2147483647, %v184_v8  ;;  %v111_v44 = vsel %vm305_vm7, 1.0, %v184_v8 }
  0x39   :  { %v92_v11 = vadd.f32 1.0, %v186_v9  ;;  %v95_v17 = vmul.f32 -0.5, %v186_v9  ;;  %v98_v28 = vand.u32 2147483647, %v186_v9  ;;  %v112_v47 = vsel %vm310_vm8, 1.0, %v186_v9 }
  0x3a   :  { %187 = vrcp.f32 %v83_v10  ;;  %v87_v21 = vadd.f32 1.0, %v86_v15  ;;  %vm314_vm9 = vcmp.lt.f32.partialorder %v89_v24, 0.0004427343 }
  0x3b   :  { %189 = vrcp.f32 %v92_v11  ;;  %v96_v25 = vadd.f32 1.0, %v95_v17  ;;  %vm99_vm10 = vcmp.lt.f32.partialorder %v98_v28, 0.0004427343 }
  0x3c   :  { %191 = vlog2.f32 %v83_v10  ;;  %v88_v37 = vmul.f32 %v184_v8, %v87_v21 }
  0x3d   :  { %193 = vlog2.f32 %v92_v11  ;;  %v97_v42 = vmul.f32 %v186_v9, %v96_v25 }
  0x44   :  { %v188_v14 = vpop.eup %187 }
  0x45   :  { %v190_v16 = vpop.eup %189  ;;  %v117_v18 = vmul.f32 %v188_v14, %v83_v10 }
  0x46   :  { %v118_v19 = vmul.f32 %v190_v16, %v92_v11  ;;  %v192_v23 = vpop.eup %191 }
  0x47   :  { %v119_v20 = vsub.f32 2.0, %v117_v18  ;;  %v194_v27 = vpop.eup %193  ;;  %v85_v36 = vmul.f32 0.6931472, %v192_v23 }
  0x48   :  { %v120_v22 = vsub.f32 2.0, %v118_v19  ;;  %v94_v41 = vmul.f32 0.6931472, %v194_v27 }
  0x49   :  { %v121_v26 = vmul.f32 %v188_v14, %v119_v20  ;;  %v91_v50 = vsel %vm314_vm9, %v88_v37, %v85_v36 }
  0x4a   :  { %v122_v29 = vmul.f32 %v190_v16, %v120_v22  ;;  %v100_v52 = vsel %vm99_vm10, %v97_v42, %v94_v41  ;;  %v101_v55 = vadd.f32 %v91_v50, %v81_v46 }
  0x4b   :  { %v123_v34 = vmul.f32 %v121_v26, %v83_v10  ;;  %v102_v57 = vadd.f32 %v100_v52, %v82_v49 }
  0x4c   :  { %v124_v39 = vmul.f32 %v122_v29, %v92_v11 }
  0x4d   :  { %v125_v43 = vsub.f32 2.0, %v123_v34 }
  0x4e   :  { %v126_v45 = vsub.f32 2.0, %v124_v39 }
  0x4f   :  { %v127_v48 = vmul.f32 %v125_v43, %v121_v26 }
  0x50   :  { %v128_v51 = vmul.f32 %v126_v45, %v122_v29 }
  0x51   :  { %v129_v53 = vmul.f32 %v127_v48, %v111_v44 }
  0x52   :  { %v130_v54 = vmul.f32 %v128_v51, %v112_v47 }
  0x53   :  { %v131_v56 = vsub.f32 1.0, %v129_v53 }
  0x54   :  { %v132_v58 = vsub.f32 1.0, %v130_v54 }
  0x55   :  { %v133_v59 = vmul.f32 %v131_v56, %v131_v56 }
  0x56   :  { %v134_v60 = vmul.f32 %v132_v58, %v132_v58 }
  0x57   :  { %v135_v61 = vmul.f32 %v133_v59, %v101_v55 }
  0x58   :  { %v136_v62 = vmul.f32 %v134_v60, %v102_v57 }
  0x5a   :  { %v138_v63 = vadd.f32 %v136_v62, %v135_v61 }
  0x5c   :  { %145 = vadd.xlane.f32.xlu0 %v138_v63 }
  0xe9   :  { %v146_v0 = vpop.xlane.xlu0 %145 }
  0xea   :  { %v147_v1 = vrot.slane %v146_v0, 4 }
  0xec   :  { %v148_v2 = vadd.f32 %v147_v1, %v146_v0 }
  0xee   :  { %v149_v3 = vrot.slane %v148_v2, 2 }
  0xf0   :  { %v150_v4 = vadd.f32 %v149_v3, %v148_v2 }
  0xf2   :  { %v151_v5 = vrot.slane %v150_v4, 1 }
  0xf4   :  { %v152_v6 = vadd.f32 %v151_v5, %v150_v4 }
  0xf6   :  { %175 = vpush %v152_v6 }
 0x127   :  { %s176_s1 = spop %175 }
 0x128   :  { %155 = sst [smem:[#allocation8]] %s176_s1 }
 0x129   :  { %248 = shalt.err (!%p245_p4)
}
 0x12a   :  { %s260_s13 = smov [#allocation8]  }
 0x12b   :  { %163 = dma.smem_to_hbm %s260_s13, 16, %s338_s2, [#allocation5]  }
 0x12c   :  { %253 = dma.done.wait [#allocation5], 16  }
 0x12d   :  { %254 = vsyncadd [#allocation5], 4294967280 }
 0x12e   :  { %167 = sfence }
 0x12f   :  { %168 = vsyncpa [#allocation4], 1 }
 0x130   :  { %169 = vsyncpa [#allocation7], 1 }
 0x131   :  { %170 = vsyncpa [#allocation5], 1 }

</bundles_post_ra>
